<compile_context>
chip_gen: v5e
topology: v5e:2x2
jax: 0.10.0
libtpu: 0.0.40
codegen_flags: <defaults>
</compile_context>

<pallas_src>
import functools

import jax
import jax.numpy as jnp
from jax.experimental import pallas as pl
from jax.experimental.pallas import tpu as pltpu


def _layernorm_kernel(x_ref, g_ref, b_ref, o_ref, *, eps, feat):
    x = x_ref[...].astype(jnp.float32)                       # (tile_rows, feat)
    n = jnp.float32(feat)

    mean = jnp.sum(x, axis=-1, keepdims=True) / n            # (tile_rows, 1)
    xc = x - mean

    # Two-pass centered variance: numerically stable; free because the tile is
    # already in VMEM and the kernel is HBM-bound. Unbiased (N-1) to match
    # torch.std's default. feat == 1 yields NaN (0/0), same as torch.
    var = jnp.sum(xc * xc, axis=-1, keepdims=True) / jnp.float32(feat - 1)
    std = jnp.sqrt(var)

    # Exact reciprocal for torch parity. (Only approx=True lowers to the EUP
    # vrcp; on a (tile_rows, 1) operand either choice is perf-neutral.)
    inv = pl.reciprocal(std + jnp.float32(eps), approx=False)

    g = g_ref[...]                                           # (1, feat), f32, resident
    b = b_ref[...]                                           # (1, feat), f32, resident
    o_ref[...] = (xc * inv * g + b).astype(o_ref.dtype)


def _vmem_capacity_bytes():
    """Per-core VMEM capacity, with graceful fallbacks."""
    try:
        cap = getattr(pltpu.get_tpu_info(), "vmem_capacity_bytes", None)
        if cap:
            return int(cap)
    except Exception:
        pass
    try:
        kind = jax.devices()[0].device_kind.lower()
        if "v7" in kind:
            return 64 << 20
    except Exception:
        pass
    return 128 << 20


def _budgets():
    """(max_block_bytes, vmem_limit_bytes) tuned per TPU generation."""
    cap = _vmem_capacity_bytes()
    if cap <= (64 << 20):          # v7x: 64 MiB VMEM per TensorCore
        return 6 << 20, 56 << 20
    return 8 << 20, 96 << 20       # v5e / v6e: 128 MiB VMEM


def _sublane(dtype):
    itemsize = jnp.dtype(dtype).itemsize
    return {4: 8, 2: 16, 1: 32}.get(itemsize, 8)


def _choose_tile_rows(rows, feat, dtype, max_block_bytes):
    """Sublane-aligned row tile, ~max_block_bytes of f32 working set per step."""
    sub = _sublane(dtype)
    # Size against the f32 working set (kernel upcasts the tile) so sub-32-bit
    # inputs don't blow VMEM with their f32 temporaries.
    bytes_per_row = max(feat * max(jnp.dtype(dtype).itemsize, 4), 1)
    t = (max_block_bytes // bytes_per_row) // sub * sub
    t = max(t, sub)
    rows_up = -(-rows // sub) * sub                          # rows rounded up to sublane
    t = min(t, rows_up)
    # v7x has 2 TensorCores: keep >= 2 grid steps so the "parallel" axis shards
    # across both cores (no-op on single-TC v5e/v6e, harmless there).
    if rows_up > sub and -(-rows // t) < 2:
        t = max(sub, (-(-(rows_up // 2) // sub)) * sub)
    return t


def layer_norm(x, gamma, beta, eps=1e-6, tile_rows=None, donate_input=False):
    """x: (..., feature). Normalizes over the last axis (matches the PyTorch module)."""
    orig_shape = x.shape
    feat = orig_shape[-1]
    x2 = x.reshape(-1, feat)                                 # (rows, feature)
    rows = x2.shape[0]

    max_block_bytes, vmem_limit = _budgets()
    if tile_rows is None:
        tile_rows = _choose_tile_rows(rows, feat, x.dtype, max_block_bytes)

    # Hoist the param f32 casts out of the kernel: done once, stays resident.
    g2 = gamma.reshape(1, feat).astype(jnp.float32)
    b2 = beta.reshape(1, feat).astype(jnp.float32)

    # No padding pass: Pallas masks partial last-block writes, and rows are
    # independent, so garbage rows in a partial block never contaminate output.
    grid = (pl.cdiv(rows, tile_rows),)

    itemsize = jnp.dtype(x.dtype).itemsize
    cost = pl.CostEstimate(
        flops=7 * rows * feat,
        transcendentals=0,
        bytes_accessed=2 * rows * feat * itemsize + 2 * feat * 4,
    )

    kernel = functools.partial(_layernorm_kernel, eps=eps, feat=feat)

    # TODO(synk): for feat % 128 != 0 (e.g. the 32-wide demo) the output is not
    # lane-dense (masked partial stores); pack multiple rows per 128-lane group
    # with a segmented reduce if small-d_model throughput ever matters.
    out = pl.pallas_call(
        kernel,
        out_shape=jax.ShapeDtypeStruct((rows, feat), x.dtype),
        grid_spec=pltpu.PrefetchScalarGridSpec(
            num_scalar_prefetch=0,
            grid=grid,
            in_specs=[
                pl.BlockSpec((tile_rows, feat), lambda i: (i, 0)),
                pl.BlockSpec((1, feat), lambda i: (0, 0)),    # gamma stays resident
                pl.BlockSpec((1, feat), lambda i: (0, 0)),    # beta stays resident
            ],
            out_specs=pl.BlockSpec((tile_rows, feat), lambda i: (i, 0)),
        ),
        compiler_params=pltpu.CompilerParams(
            dimension_semantics=("parallel",),
            vmem_limit_bytes=vmem_limit,
        ),
        cost_estimate=cost,
        input_output_aliases=({0: 0} if donate_input else {}),
    )(x2, g2, b2)

    return out.reshape(orig_shape)


def layer_norm_ref(x, gamma, beta, eps=1e-6):
    """Pure-JAX reference matching the PyTorch module."""
    mean = jnp.mean(x, axis=-1, keepdims=True)
    xc = x - mean
    var = jnp.sum(xc * xc, axis=-1, keepdims=True) / (x.shape[-1] - 1)
    std = jnp.sqrt(var)
    return gamma * xc / (std + eps) + beta


if __name__ == "__main__":
    key = jax.random.PRNGKey(0)
    batch, seq, feature = 2, 8, 32

    x = jax.random.normal(key, (batch, seq, feature), dtype=jnp.float32)

    # Deterministic parameter init, exactly as the module's __init__.
    a_2 = jnp.ones((feature,), dtype=jnp.float32)
    b_2 = jnp.zeros((feature,), dtype=jnp.float32)

    out = layer_norm(x, a_2, b_2, eps=1e-6)
    out = jax.block_until_ready(out)

    ref = layer_norm_ref(x, a_2, b_2, eps=1e-6)
    assert out.shape == x.shape
    assert jnp.allclose(out, ref, atol=1e-5, rtol=1e-5), (
        f"max err {jnp.max(jnp.abs(out - ref))}")

    print("KERNEL_OK")
</pallas_src>

<mosaic_0001>
module attributes {stable_mosaic.version = 11 : i64} {
  func.func @_layernorm_kernel(%arg0: i32, %arg1: memref<8x32xf32, #tpu.memory_space<vmem>>, %arg2: memref<1x32xf32, #tpu.memory_space<vmem>>, %arg3: memref<1x32xf32, #tpu.memory_space<vmem>>, %arg4: memref<8x32xf32, #tpu.memory_space<vmem>>) attributes {dimension_semantics = [#tpu.dimension_semantics<parallel>], iteration_bounds = array<i64: 2>, scalar_prefetch = 0 : i64, scratch_operands = 0 : i64, tpu.core_type = #tpu.core_type<tc>, window_params = [{transform_indices = @transform_0, window_bounds = array<i64: 8, 32>}, {pipeline_mode = #tpu.pipeline_mode<synchronous>, transform_indices = @transform_1, window_bounds = array<i64: 1, 32>}, {pipeline_mode = #tpu.pipeline_mode<synchronous>, transform_indices = @transform_2, window_bounds = array<i64: 1, 32>}, {transform_indices = @transform_3, window_bounds = array<i64: 8, 32>}]} {
    %c0 = arith.constant 0 : index
    %c0_0 = arith.constant 0 : index
    %0 = vector.load %arg1[%c0, %c0_0] : memref<8x32xf32, #tpu.memory_space<vmem>>, vector<8x32xf32>
    %cst = arith.constant dense<0.000000e+00> : vector<8xf32>
    %1 = vector.multi_reduction <add>, %0, %cst [1] : vector<8x32xf32> to vector<8xf32>
    %2 = vector.shape_cast %1 : vector<8xf32> to vector<8x1xf32>
    %cst_1 = arith.constant 3.200000e+01 : f32
    %3 = vector.broadcast %cst_1 : f32 to vector<8x1xf32>
    %4 = arith.divf %2, %3 : vector<8x1xf32>
    %5 = vector.broadcast %4 : vector<8x1xf32> to vector<8x32xf32>
    %6 = arith.subf %0, %5 : vector<8x32xf32>
    %7 = arith.mulf %6, %6 : vector<8x32xf32>
    %cst_2 = arith.constant dense<0.000000e+00> : vector<8xf32>
    %8 = vector.multi_reduction <add>, %7, %cst_2 [1] : vector<8x32xf32> to vector<8xf32>
    %9 = vector.shape_cast %8 : vector<8xf32> to vector<8x1xf32>
    %cst_3 = arith.constant 3.100000e+01 : f32
    %10 = vector.broadcast %cst_3 : f32 to vector<8x1xf32>
    %11 = arith.divf %9, %10 : vector<8x1xf32>
    %12 = math.sqrt %11 : vector<8x1xf32>
    %cst_4 = arith.constant 9.99999997E-7 : f32
    %13 = vector.broadcast %cst_4 : f32 to vector<8x1xf32>
    %14 = arith.addf %12, %13 : vector<8x1xf32>
    %15 = tpu.reciprocal %14 : vector<8x1xf32> -> vector<8x1xf32>
    %c0_5 = arith.constant 0 : index
    %c0_6 = arith.constant 0 : index
    %16 = vector.load %arg2[%c0_5, %c0_6] : memref<1x32xf32, #tpu.memory_space<vmem>>, vector<1x32xf32>
    %c0_7 = arith.constant 0 : index
    %c0_8 = arith.constant 0 : index
    %17 = vector.load %arg3[%c0_7, %c0_8] : memref<1x32xf32, #tpu.memory_space<vmem>>, vector<1x32xf32>
    %18 = vector.broadcast %15 : vector<8x1xf32> to vector<8x32xf32>
    %19 = arith.mulf %6, %18 : vector<8x32xf32>
    %20 = vector.broadcast %16 : vector<1x32xf32> to vector<8x32xf32>
    %21 = arith.mulf %19, %20 : vector<8x32xf32>
    %22 = vector.broadcast %17 : vector<1x32xf32> to vector<8x32xf32>
    %23 = arith.addf %21, %22 : vector<8x32xf32>
    %c0_9 = arith.constant 0 : index
    %c0_10 = arith.constant 0 : index
    %24 = vector.load %arg4[%c0_9, %c0_10] : memref<8x32xf32, #tpu.memory_space<vmem>>, vector<8x32xf32>
    tpu.vector_store %arg4[%c0_9, %c0_10], %23 {strides = array<i32>} : memref<8x32xf32, #tpu.memory_space<vmem>>, vector<8x32xf32>,
    return
  }
  func.func @transform_0(%arg0: i32) -> (i32, i32) {
    %c0_i32 = arith.constant 0 : i32
    %c0_i32_0 = arith.constant 0 : i32
    return %arg0, %c0_i32 : i32, i32
  }
  func.func @transform_1(%arg0: i32) -> (i32, i32) {
    %c0_i32 = arith.constant 0 : i32
    %c0_i32_0 = arith.constant 0 : i32
    %c0_i32_1 = arith.constant 0 : i32
    return %c0_i32, %c0_i32_0 : i32, i32
  }
  func.func @transform_2(%arg0: i32) -> (i32, i32) {
    %c0_i32 = arith.constant 0 : i32
    %c0_i32_0 = arith.constant 0 : i32
    %c0_i32_1 = arith.constant 0 : i32
    return %c0_i32, %c0_i32_0 : i32, i32
  }
  func.func @transform_3(%arg0: i32) -> (i32, i32) {
    %c0_i32 = arith.constant 0 : i32
    %c0_i32_0 = arith.constant 0 : i32
    return %arg0, %c0_i32 : i32, i32
  }
}

</mosaic_0001>

<bundles_post_ra>
// kernel: tpu_custom_call.1
= control target key start
LH: loop header
LB: loop body
LE: loop exit
PB: predicated region body
PF: predicated region fallthrough
CT: control target
= control target key end

     0   :  { %8 = vsyncpa [#allocation3], 0  ;;  %s750_s0 = inlined_call_operand.hbm [shape: f32[16,32], index: 0, kind: input, shape index: {}]   ;;  %s751_s1 = inlined_call_operand.hbm [shape: f32[1,32], index: 1, kind: input, shape index: {}]   ;;  %s752_s2 = inlined_call_operand.vmem [shape: f32[1,32], index: 2, kind: input, shape index: {}]   ;;  %s753_s3 = inlined_call_operand.hbm [shape: f32[16,32], index: 3, kind: output, shape index: {}]  }
   0x1   :  { %10 = vsyncpa [#allocation3 + $0x1], 0 }
   0x2   :  { %11 = vsyncpa [#allocation6], 0 }
   0x3   :  { %12 = vsyncpa [#allocation4], 0 }
   0x4   :  { %14 = vsyncpa [#allocation4 + $0x1], 0  ;;  %s602_s12 = smov 0   ;;  %s604_s13 = smov 0  }
   0x5   :  { %s606_s14 = smov 0   ;;  %s608_s15 = smov 0  }
   0x6 LB: > { %s623_s16 = sadd.s32 4294967295, %s577_s15   ;;  %s364_s17 = sadd.s32 4294967294, %s577_s15   ;;  %s577_s15 = sphi %s608_s15, %s763_s15   ;;  %s573_s14 = sphi %s606_s14, %s762_s14   ;;  %s569_s13 = sphi %s604_s13, %s761_s13   ;;  %s565_s12 = sphi %s602_s12, %s760_s12  }
   0x7   : > { %p40_p0 = scmp.ne.s32.totalorder %s569_s13, %s565_s12  ;;  %p41_p1 = scmp.eq.s32.totalorder %s623_s16, 0 }
   0x8   : > { %p106_p2 = scmp.eq.s32.totalorder %s623_s16, 1  ;;  %p112_p3 = scmp.eq.s32.totalorder %s364_s17, 1 }
   0x9   : > { %p632_p4 = por %p41_p1, %p40_p0  ;;  %p365_p5 = scmp.ge.s32.totalorder %s577_s15, 1 }
   0xa   : > { %p637_p6 = por %p112_p3, %p40_p0  ;;  %p119_p7 = scmp.lt.s32.totalorder %s577_s15, 3 }
   0xb   : > { %s131_s22 = sshll.u32 %s751_s1, 4  ;;  %s579_s24 = smov [#allocation5]   ;;  %s132_s22 = int_to_ptr.hbm [resolvable:$true] %s131_s22 }
   0xc   : > { %p645_p8 = pnand %p365_p5, %p119_p7  ;;  %s133_s25 = sshll.u32 %s579_s24, 4  ;;  %s134_s25 = int_to_ptr.vmem [resolvable:$true] %s133_s25 }
   0xd   : > { %s655_s26 = sadd.s32 1, %s577_s15   ;;  %s27_s27 = sadd.s32 1, %s573_s14 }
   0xe   : > { %p386_p10 = pneg %p645_p8  ;;  %s24_s28 = ssub.s32 %s577_s15, %s655_s26 }
   0xf   : > { %p25_p12 = scmp.eq.s32.totalorder %s24_s28, 0  ;;  %p34_p13 = scmp.ne.s32.totalorder %s573_s14, %s569_s13 }
  0x10   : > { %p387_p11 = pnand %p386_p10, %p41_p1  ;;  %p35_p0 = scmp.eq.s32.totalorder %s577_s15, 0 }
  0x11   : > { %s664_s29 = scalar_select %p25_p12, %s573_s14, %s27_s27  }
  0x12   : > { %389 = dma.hbm_to_vmem [thread:$0]  (!%p387_p11), %s132_s22, 16, %s134_s25, [#allocation6]  }
  0x13   : > { %p668_p3 = por %p106_p2, %p34_p13  ;;  %p399_p5 = scmp.lt.s32.totalorder %s577_s15, 2 }
  0x14   : > { %s147_s4 = sand.u32 1, %s573_s14   ;;  %s369_s5 = sshll.u32 %s577_s15, 3 }
  0x15   : > { %p36_p7 = por %p35_p0, %p34_p13  ;;  %s368_s6 = sshll.u32 %s147_s4, 3 }
  0x16   : > { %s155_s9 = scalar_lea.hbm %s750_s0, %s369_s5  ;;  %s151_s11 = scalar_lea.vmem [#allocation2], %s368_s6 }
  0x17   : > { %s157_s10 = sshll.u32 %s155_s9, 4  ;;  %s159_s17 = sshll.u32 %s151_s11, 4  ;;  %s158_s10 = int_to_ptr.hbm [resolvable:$true] %s157_s10  ;;  %s160_s17 = int_to_ptr.vmem [resolvable:$true] %s159_s17 }
  0x18   : > { %p678_p10 = pnand %p399_p5, %p36_p7  ;;  %s148_s21 = scalar_lea.sflag [#allocation3], %s147_s4 }
  0x19   : > { %s477_s22 = sshra.s32 %s158_s10, 4  ;;  %s484_s28 = scalar_lea.hbm %s750_s0, 16  ;;  %s478_s22 = int_to_ptr.hbm [resolvable:$true] %s477_s22 }
  0x1a   : > { %s479_s24 = scalar_lea.hbm %s478_s22, 8  ;;  %p481_p11 = pneg %p678_p10 }
  0x1b   : > { %p480_p2 = scmp.ne.s32.totalorder %s478_s22, %s479_s24  ;;  %p485_p0 = scmp.lt.s32.totalorder %s478_s22, %s750_s0 }
  0x1c   : > { %p486_p5 = scmp.lt.s32.totalorder %s484_s28, %s479_s24 }
  0x1d   : > { %p482_p12 = pnand %p481_p11, %p480_p2 }
  0x1e   : > { %p487_p7 = por %p486_p5, %p485_p0 }
  0x1f   : > { %p483_p13 = pneg %p482_p12 }
  0x21   : > { %p488_p9 = pnand %p487_p7, %p483_p13 }
  0x23   : > { %491 = shalt.err (!%p488_p9)
}
  0x24   : > { %393 = dma.hbm_to_vmem [thread:$0]  (!%p678_p10), %s158_s10, 128, %s160_s17, %s148_s21  }
  0x25   : > { %168 = sbr.rel (%p645_p8) target bundleno = 337 (0x151), region = 32  ;;  %s695_s4 = sand.u32 (!%p645_p8), 1, %s569_s13  }
  0x26   : > { %s371_s7 = sshll.u32 (!%p645_p8), %s695_s4, 3  ;;  %s171_s8 = scalar_lea.sflag (!%p645_p8), [#allocation3], %s695_s4 }
  0x27   : > { %s174_s9 = scalar_lea.vmem (!%p645_p8), [#allocation2], %s371_s7 }
  0x2a   : > { %552 = dma.done.wait (%p632_p4), %s171_s8, 128  }
  0x2b   : > { %554 = vsyncadd (%p632_p4), %s171_s8, 4294967168 }
  0x2c   : > { %556 = dma.done.wait (%p41_p1), [#allocation6], 16  }
  0x2d   : > { %558 = vsyncadd (%p41_p1), [#allocation6], 4294967280  ;;  %vm204_vm0 = vcmask 261120   ;;  %v203_v0 = vld [vmem:[%s174_s9] sm:$0xff]  ;;  %v580_v2 = vmov 32.0   ;;  %v581_v14 = vmov 31.0  }
  0x2e   : > { %v205_v1 = vsel %vm204_vm0, %v203_v0, 0.0  ;;  %439 = vrcp.f32 %v580_v2  ;;  %s375_s18 = sshll.u32 %s623_s16, 3  ;;  %v437_v43 = vld [vmem:[#allocation5] ss:$0 sm:$0xff]  ;;  %v438_v46 = vld [vmem:[%s752_s2] ss:$0 sm:$0xff] }
  0x2f   : > { %206 = vadd.xlane.f32.xlu0 %v205_v1  ;;  %441 = vrcp.f32 %v581_v14  ;;  %s279_s11 = scalar_lea.hbm %s753_s3, %s375_s18  ;;  %s202_s16 = scalar_lea.vmem [#allocation7], %s371_s7 }
  0x30   : > { %s281_s21 = sshll.u32 %s202_s16, 4  ;;  %s283_s22 = sshll.u32 %s279_s11, 4  ;;  %s282_s21 = int_to_ptr.vmem [resolvable:$true] %s281_s21  ;;  %s284_s22 = int_to_ptr.hbm [resolvable:$true] %s283_s22 }
  0x31   : > { %s269_s24 = scalar_lea.sflag [#allocation4], %s695_s4  ;;  %s521_s25 = sshra.s32 %s284_s22, 4  ;;  %s522_s25 = int_to_ptr.hbm [resolvable:$true] %s521_s25 }
  0x32   : > { %s523_s27 = scalar_lea.hbm %s522_s25, 8  ;;  %s527_s6 = scalar_lea.hbm %s753_s3, 16 }
  0x33   : > { %p524_p1 = scmp.ne.s32.totalorder %s522_s25, %s523_s27  ;;  %p528_p9 = scmp.lt.s32.totalorder %s522_s25, %s753_s3 }
  0x34   : > { %v440_v3 = vpop.eup %439  ;;  %p529_p10 = scmp.lt.s32.totalorder %s527_s6, %s523_s27 }
  0x35   : > { %v209_v4 = vmul.f32 32.0, %v440_v3  ;;  %vm213_vm1 = vweird.f32 %v440_v3  ;;  %v442_v15 = vpop.eup %441  ;;  %p525_p4 = pnand %p524_p1, %p668_p3 }
  0x36   : > { %v222_v16 = vmul.f32 31.0, %v442_v15  ;;  %vm226_vm2 = vweird.f32 %v442_v15  ;;  %p530_p2 = por %p529_p10, %p528_p9 }
  0x37   : > { %v210_v5 = vsub.f32 1.0, %v209_v4  ;;  %p526_p8 = pneg %p525_p4 }
  0x38   : > { %v223_v17 = vsub.f32 1.0, %v222_v16 }
  0x39   : > { %v211_v6 = vmul.f32 %v440_v3, %v210_v5  ;;  %p531_p11 = pnand %p530_p2, %p526_p8 }
  0x3a   : > { %v224_v18 = vmul.f32 %v442_v15, %v223_v17 }
  0x3b   : > { %v212_v7 = vadd.f32 %v440_v3, %v211_v6 }
  0x3c   : > { %v225_v19 = vadd.f32 %v442_v15, %v224_v18 }
  0x3d   : > { %v214_v8 = vsel %vm213_vm1, %v440_v3, %v212_v7 }
  0x3e   : > { %v227_v20 = vsel %vm226_vm2, %v442_v15, %v225_v19 }
  0xa2   : > { %v207_v9 = vpop.xlane.xlu0 %206 }
  0xa3   : > { %v215_v10 = vmul.f32 %v214_v8, %v207_v9 }
  0xa5   : > { %v216_v11 = vsub.f32 %v203_v0, %v215_v10 }
  0xa7   : > { %v217_v12 = vmul.f32 %v216_v11, %v216_v11 }
  0xa9   : > { %v218_v13 = vsel %vm204_vm0, %v217_v12, 0.0 }
  0xaa   : > { %219 = vadd.xlane.f32.xlu0 %v218_v13 }
 0x11d   : > { %v220_v21 = vpop.xlane.xlu0 %219 }
 0x11e   : > { %v228_v22 = vmul.f32 %v227_v20, %v220_v21 }
 0x120   : > { %443 = vrsqrt.f32 %v228_v22  ;;  %vm236_vm3 = vcmp.eq.f32.partialorder %v228_v22, inf  ;;  %v239_v30 = vand.u32 2147483648, %v228_v22  ;;  %vm238_vm4 = vcmp.eq.f32.partialorder %v228_v22, 0.0 }
 0x126   : > { %v444_v23 = vpop.eup %443 }
 0x127   : > { %v230_v24 = vmul.f32 %v444_v23, %v228_v22 }
 0x129   : > { %v231_v25 = vmul.f32 %v444_v23, %v230_v24 }
 0x12b   : > { %v232_v26 = vmul.f32 0.5, %v231_v25 }
 0x12d   : > { %v233_v27 = vsub.f32 1.5, %v232_v26 }
 0x12f   : > { %v234_v28 = vmul.f32 %v444_v23, %v233_v27 }
 0x131   : > { %v235_v29 = vmul.f32 %v234_v28, %v228_v22 }
 0x133   : > { %v237_v31 = vsel %vm236_vm3, %v228_v22, %v235_v29 }
 0x134   : > { %v240_v32 = vsel %vm238_vm4, %v239_v30, %v237_v31 }
 0x135   : > { %v241_v33 = vadd.f32 1e-06, %v240_v32 }
 0x137   : > { %445 = vrcp.f32 %v241_v33  ;;  %v253_v37 = vand.u32 2147483648, %v241_v33  ;;  %v251_v39 = vand.u32 2147483647, %v241_v33  ;;  %vm247_vm6 = vweird.f32 %v241_v33 }
 0x139   : > { %v254_v41 = vor.u32 1.1754944e-38, %v253_v37  ;;  %vm252_vm8 = vcmp.eq.f32.partialorder %v251_v39, 8.507059e+37 }
 0x13d   : > { %v446_v34 = vpop.eup %445 }
 0x13e   : > { %v243_v35 = vmul.f32 %v446_v34, %v241_v33  ;;  %vm248_vm5 = vweird.f32 %v446_v34 }
 0x13f   : > { %vm249_vm7 = vmor %vm247_vm6, %vm248_vm5 }
 0x140   : > { %v244_v36 = vsub.f32 1.0, %v243_v35 }
 0x142   : > { %v245_v38 = vmul.f32 %v446_v34, %v244_v36 }
 0x144   : > { %v246_v40 = vadd.f32 %v446_v34, %v245_v38 }
 0x146   : > { %v250_v42 = vsel %vm249_vm7, %v446_v34, %v246_v40 }
 0x147   : > { %v255_v44 = vsel %vm252_vm8, %v254_v41, %v250_v42 }
 0x148   : > { %v258_v45 = vmul.f32 %v255_v44, %v216_v11 }
 0x14a   : > { %v262_v47 = vmul.f32 %v437_v43, %v258_v45 }
 0x14c   : > { %v266_v48 = vadd.f32 %v438_v46, %v262_v47 }
 0x14e   : > { %267 = vst.msk [vmem:[%s202_s16] sm:$0xff] %vm204_vm0, %v266_v48 }
 0x14f   : > { %534 = shalt.err (!%p531_p11)
}
 0x150   : > { %384 = dma.vmem_to_hbm [thread:$0]  (%p668_p3), %s282_s21, 128, %s284_s22, %s269_s24  }
 0x151 PF: > { %s295_s4 = sand.u32 1, %s565_s12   ;;  %p759_p12 = scmp.ge.s32.totalorder %s577_s15, 2 }
 0x152   : > { %s296_s9 = scalar_lea.sflag [#allocation4], %s295_s4 }
 0x153   : > { %p395_p13 = pnand %p759_p12, %p637_p6 }
 0x155   : > { %p396_p0 = pneg %p395_p13 }
 0x157   : > { %560 = dma.done.wait (%p396_p0), %s296_s9, 128  }
 0x158   : > { %562 = vsyncadd (%p396_p0), %s296_s9, 4294967168  ;;  %p17_p5 = scmp.ge.s32.totalorder %s655_s26, 4   ;;  %s760_s12 = smov %s569_s13 }
 0x159   : > { %s761_s13 = smov %s573_s14  ;;  %s762_s14 = smov %s664_s29 }
 0x15a   : > { %s763_s15 = smov %s655_s26  ;;  %19 = sbr.rel (!%p17_p5) target bundleno = 6 (0x6), region = 81 }
 0x15f   :  { %302 = vsyncpa [#allocation3], 1 }
 0x160   :  { %304 = vsyncpa [#allocation3 + $0x1], 1 }
 0x161   :  { %305 = vsyncpa [#allocation6], 1 }
 0x162   :  { %306 = vsyncpa [#allocation4], 1 }
 0x163   :  { %308 = vsyncpa [#allocation4 + $0x1], 1 }

</bundles_post_ra>
